<compile_context>
chip_gen: v7x
topology: tpu7x:2x2x1
jax: 0.10.0
libtpu: 0.0.40
codegen_flags: <defaults>
</compile_context>

<pallas_src>
import jax
import jax.numpy as jnp
import numpy as np
from jax.experimental import pallas as pl
from jax.experimental.pallas import tpu as pltpu


def _ceil_to(n, m):
    return -(-n // m) * m


def _pick_tile(n, cap, mult):
    """Largest tile <= ~cap, multiple of `mult`, that minimizes padding."""
    if n <= cap:
        return n                            # single full-extent tile, no padding
    n_tiles = -(-n // cap)
    return _ceil_to(-(-n // n_tiles), mult)


def _augment_fused(x, g):
    """Fused K=16 Gram-trick operands: a_i . b_j == 0.5*(d_gt(i,j) - d_x(i,j)).

    rows a: (B, N, 16) = ( g, |g|^2, 1, x, |x|^2, 1, 0*6 )
    cols b: (B, 16, N) = ( -g, 1/2, |g|^2/2, x, -1/2, -|x|^2/2, 0*6 )^T
    """
    gsq = jnp.sum(g * g, axis=-1, keepdims=True)                 # (B, N, 1)
    xsq = jnp.sum(x * x, axis=-1, keepdims=True)
    ones = jnp.ones_like(gsq)
    zeros6 = jnp.zeros(g.shape[:-1] + (6,), g.dtype)
    a = jnp.concatenate([g, gsq, ones, x, xsq, ones, zeros6], axis=-1)
    b = jnp.concatenate([-g, 0.5 * ones, 0.5 * gsq,
                         x, -0.5 * ones, -0.5 * xsq, zeros6], axis=-1)
    return a, jnp.swapaxes(b, 1, 2)                              # (B,N,16), (B,16,N)


def _smooth_lddt_kernel(a_ref, b_ref, out_ref):
    # Single fused (TM,16)@(16,TN) matmul on the MXU -> m = 0.5*(d_gt - d_x).
    # HIGHEST keeps the Gram-trick cancellation accurate; with the fusion the
    # kernel is EUP(tanh)-bound on all generations so the extra passes hide
    # under the transcendental stream.
    # TODO(synk): evaluate Precision.HIGH (bf16x3) and packed bf16 tanh on
    # v5e/v6e/v7x once validated against the 2e-4 tolerance from a bundle dump.
    m = jnp.dot(a_ref[...], b_ref[...],
                preferred_element_type=jnp.float32,
                precision=jax.lax.Precision.HIGHEST)
    h = -jnp.abs(m)                                              # == -0.5 * delta
    # eps = 0.5 + 0.125*(tanh(h+.25)+tanh(h+.5)+tanh(h+1)+tanh(h+2));
    # the affine 0.5 / 0.125 constants are applied once in the wrapper.
    t = (jnp.tanh(h + 0.25) + jnp.tanh(h + 0.5) +
         jnp.tanh(h + 1.0) + jnp.tanh(h + 2.0))
    out_ref[...] = jnp.sum(t, keepdims=True)                     # (1, 1) partial


def smooth_lddt_loss(x_l, xgt_l, fstar, *, tile_m=None, tile_n=None):
    B, N, _ = x_l.shape
    # Faithful (but loss-irrelevant) side effect of the reference module.
    fstar["is_nucleotide"] = jnp.logical_or(fstar["is_dna"].astype(bool),
                                            fstar["is_rna"].astype(bool))

    x = x_l.astype(jnp.float32)
    g = xgt_l.astype(jnp.float32)
    # Pairwise distances are translation-invariant: center each coordinate set
    # per batch so |x|^2 stays small and the Gram-trick cancellation is benign.
    x = x - jnp.mean(x, axis=1, keepdims=True)
    g = g - jnp.mean(g, axis=1, keepdims=True)

    if tile_m is None:
        cap_m = 512                       # sublane-axis tile cap (all generations)
        if B == 1 and N > 16:
            # keep >= 2 parallel grid steps so both v7x TensorCores get work
            cap_m = min(cap_m, _ceil_to(-(-N // 2), 8))
        tile_m = _pick_tile(N, cap_m, 8)
    if tile_n is None:
        tile_n = _pick_tile(N, 1024, 128)  # lane-axis tile cap

    npi = _ceil_to(N, tile_m)
    npj = _ceil_to(N, tile_n)
    assert tile_m % 8 == 0 or tile_m == npi, "tile_m must be a multiple of 8 or the full dim"
    assert tile_n % 128 == 0 or tile_n == npj, "tile_n must be a multiple of 128 or the full dim"

    a, b = _augment_fused(x, g)
    if npi != N:
        a = jnp.pad(a, ((0, 0), (0, npi - N), (0, 0)))   # zero rows -> m == 0 there
    if npj != N:
        b = jnp.pad(b, ((0, 0), (0, 0), (0, npj - N)))   # zero cols -> m == 0 there

    ni, nj = npi // tile_m, npj // tile_n
    sq = pl.Squeezed
    row_spec = pl.BlockSpec((sq(), tile_m, 16), lambda bb, i, j: (bb, i, 0))
    col_spec = pl.BlockSpec((sq(), 16, tile_n), lambda bb, i, j: (bb, 0, j))
    out_spec = pl.BlockSpec((sq(), sq(), sq(), 1, 1),
                            lambda bb, i, j: (bb, i, j, 0, 0))

    # VMEM budget: ~12 (tile_m, tile_n) f32 temporaries + double-buffered K=16
    # operand tiles; capped at 56 MiB so v7x (64 MiB/TC) keeps scratch headroom.
    est = 12 * tile_m * tile_n * 4 + 2 * 2 * 2 * (tile_m + tile_n) * 16 * 4
    vmem_limit = int(min(56 * 2 ** 20, max(32 * 2 ** 20, est)))

    partials = pl.pallas_call(
        _smooth_lddt_kernel,
        out_shape=jax.ShapeDtypeStruct((B, ni, nj, 1, 1), jnp.float32),
        grid=(B, ni, nj),
        in_specs=[row_spec, col_spec],
        out_specs=out_spec,
        compiler_params=pltpu.CompilerParams(
            dimension_semantics=("parallel", "parallel", "parallel"),
            vmem_limit_bytes=vmem_limit),
    )(a, b)

    # eps = 0.5 + 0.125 * (sum of four tanh): apply the affine part once here.
    tanh_sum = jnp.sum(partials)
    total_eps = 0.5 * jnp.float32(B * npi * npj) + 0.125 * tanh_sum

    # Every invalid cell (diagonal, padded row or padded column) has delta == 0
    # and therefore eps == eps_diag; subtract its contribution analytically.
    eps_diag = 0.25 * jnp.sum(
        jax.nn.sigmoid(jnp.array([0.5, 1.0, 2.0, 4.0], jnp.float32)))
    n_valid = N * (N - 1)
    n_invalid = npi * npj - n_valid
    masked_sum = total_eps - jnp.float32(B * n_invalid) * eps_diag
    lddt = masked_sum / jnp.float32(B * n_valid)
    return 1.0 - lddt


def smooth_lddt_loss_ref(x_l, xgt_l, fstar):
    # Pure-JAX reference mirroring the PyTorch forward (torch.eyes -> eye).
    dx = jnp.sum((x_l[:, :, None] - x_l[:, None]) ** 2, axis=-1)
    dgt = jnp.sum((xgt_l[:, :, None] - xgt_l[:, None]) ** 2, axis=-1)
    delta = jnp.abs(dgt - dx)
    eps = 0.25 * (jax.nn.sigmoid(0.5 - delta) + jax.nn.sigmoid(1.0 - delta) +
                  jax.nn.sigmoid(2.0 - delta) + jax.nn.sigmoid(4.0 - delta))
    nuc = jnp.logical_or(fstar["is_dna"].astype(bool),
                         fstar["is_rna"].astype(bool))[..., None]
    c = (dgt < 30.0) | nuc | ((dgt < 15.0) | ~nuc)
    c = c & ~jnp.eye(x_l.shape[1], dtype=bool)[None]
    lddt = jnp.sum(jnp.where(c, eps, 0.0)) / jnp.sum(c)
    return 1.0 - lddt


if __name__ == "__main__":
    B, N = 2, 45
    key = jax.random.PRNGKey(0)
    k1, k2, k3, k4 = jax.random.split(key, 4)
    # Coordinates in angstrom-ish scale so squared distances span the thresholds.
    x_l = jax.random.normal(k1, (B, N, 3), dtype=jnp.float32) * 3.0
    xGT_l = x_l + jax.random.normal(k2, (B, N, 3), dtype=jnp.float32) * 0.5
    fstar = {
        "is_dna": jax.random.bernoulli(k3, 0.3, (B, N)).astype(jnp.int32),
        "is_rna": jax.random.bernoulli(k4, 0.3, (B, N)).astype(jnp.int32),
    }

    ref = jax.block_until_ready(smooth_lddt_loss_ref(x_l, xGT_l, fstar))

    # Multi-tile path: grid = (B, 3, 1); both row and column padding exercise
    # the analytic (delta == 0) correction in the wrapper.
    out_tiled = jax.block_until_ready(
        smooth_lddt_loss(x_l, xGT_l, fstar, tile_m=16, tile_n=128))
    np.testing.assert_allclose(np.asarray(out_tiled), np.asarray(ref),
                               rtol=2e-4, atol=2e-5)

    # Default (single-tile, no padding) path.
    out_default = jax.block_until_ready(smooth_lddt_loss(x_l, xGT_l, fstar))
    np.testing.assert_allclose(np.asarray(out_default), np.asarray(ref),
                               rtol=2e-4, atol=2e-5)

    print("KERNEL_OK")
</pallas_src>

<mosaic_0001>
module attributes {stable_mosaic.version = 11 : i64} {
  func.func @_smooth_lddt_kernel(%arg0: i32, %arg1: i32, %arg2: i32, %arg3: memref<1x16x16xf32, #tpu.memory_space<vmem>>, %arg4: memref<1x16x128xf32, #tpu.memory_space<vmem>>, %arg5: memref<1x1x1x1x1xf32, #tpu.memory_space<vmem>>) attributes {dimension_semantics = [#tpu.dimension_semantics<parallel>, #tpu.dimension_semantics<parallel>, #tpu.dimension_semantics<parallel>], iteration_bounds = array<i64: 2, 3, 1>, scalar_prefetch = 0 : i64, scratch_operands = 0 : i64, tpu.core_type = #tpu.core_type<tc>, window_params = [{transform_indices = @transform_0, window_bounds = array<i64: 1, 16, 16>}, {transform_indices = @transform_1, window_bounds = array<i64: 1, 16, 128>}, {transform_indices = @transform_2, window_bounds = array<i64: 1, 1, 1, 1, 1>}]} {
    %c0 = arith.constant 0 : index
    %c0_0 = arith.constant 0 : index
    %c0_1 = arith.constant 0 : index
    %0 = vector.load %arg3[%c0, %c0_0, %c0_1] : memref<1x16x16xf32, #tpu.memory_space<vmem>>, vector<1x16x16xf32>
    %1 = vector.shape_cast %0 : vector<1x16x16xf32> to vector<16x16xf32>
    %c0_2 = arith.constant 0 : index
    %c0_3 = arith.constant 0 : index
    %c0_4 = arith.constant 0 : index
    %2 = vector.load %arg4[%c0_2, %c0_3, %c0_4] : memref<1x16x128xf32, #tpu.memory_space<vmem>>, vector<1x16x128xf32>
    %3 = vector.shape_cast %2 : vector<1x16x128xf32> to vector<16x128xf32>
    %cst = arith.constant dense<0.000000e+00> : vector<16x128xf32>
    %4 = tpu.matmul %1, %3, %cst {dimension_numbers = #tpu.dot_dimension_numbers<[1], [0], [0], [1], [0, 0, 1, 1], [], []>, precision = #tpu.contract_precision<fp32>} : vector<16x16xf32>, vector<16x128xf32>, vector<16x128xf32> -> vector<16x128xf32>
    %5 = math.absf %4 : vector<16x128xf32>
    %cst_5 = arith.constant 0.000000e+00 : f32
    %6 = vector.broadcast %cst_5 : f32 to vector<16x128xf32>
    %7 = arith.subf %6, %5 : vector<16x128xf32>
    %cst_6 = arith.constant 2.500000e-01 : f32
    %8 = vector.broadcast %cst_6 : f32 to vector<16x128xf32>
    %9 = arith.addf %7, %8 : vector<16x128xf32>
    %10 = math.tanh %9 : vector<16x128xf32>
    %cst_7 = arith.constant 5.000000e-01 : f32
    %11 = vector.broadcast %cst_7 : f32 to vector<16x128xf32>
    %12 = arith.addf %7, %11 : vector<16x128xf32>
    %13 = math.tanh %12 : vector<16x128xf32>
    %14 = arith.addf %10, %13 : vector<16x128xf32>
    %cst_8 = arith.constant 1.000000e+00 : f32
    %15 = vector.broadcast %cst_8 : f32 to vector<16x128xf32>
    %16 = arith.addf %7, %15 : vector<16x128xf32>
    %17 = math.tanh %16 : vector<16x128xf32>
    %18 = arith.addf %14, %17 : vector<16x128xf32>
    %cst_9 = arith.constant 2.000000e+00 : f32
    %19 = vector.broadcast %cst_9 : f32 to vector<16x128xf32>
    %20 = arith.addf %7, %19 : vector<16x128xf32>
    %21 = math.tanh %20 : vector<16x128xf32>
    %22 = arith.addf %18, %21 : vector<16x128xf32>
    %23 = vector.shape_cast %22 : vector<16x128xf32> to vector<1x16x128xf32>
    %cst_10 = arith.constant dense<0.000000e+00> : vector<1xf32>
    %24 = vector.multi_reduction <add>, %23, %cst_10 [1, 2] : vector<1x16x128xf32> to vector<1xf32>
    %25 = vector.shape_cast %24 : vector<1xf32> to vector<1x1x1xf32>
    %26 = vector.extract %25[0, 0, 0] : f32 from vector<1x1x1xf32>
    %27 = vector.broadcast %26 : f32 to vector<1x1xf32>
    %c0_11 = arith.constant 0 : index
    %c0_12 = arith.constant 0 : index
    %c0_13 = arith.constant 0 : index
    %c0_14 = arith.constant 0 : index
    %c0_15 = arith.constant 0 : index
    %28 = vector.load %arg5[%c0_11, %c0_12, %c0_13, %c0_14, %c0_15] : memref<1x1x1x1x1xf32, #tpu.memory_space<vmem>>, vector<1x1x1x1x1xf32>
    %29 = vector.shape_cast %28 : vector<1x1x1x1x1xf32> to vector<1x1xf32>
    %30 = vector.shape_cast %27 : vector<1x1xf32> to vector<1x1x1x1x1xf32>
    tpu.vector_store %arg5[%c0_11, %c0_12, %c0_13, %c0_14, %c0_15], %30 {strides = array<i32>} : memref<1x1x1x1x1xf32, #tpu.memory_space<vmem>>, vector<1x1x1x1x1xf32>,
    return
  }
  func.func @transform_0(%arg0: i32, %arg1: i32, %arg2: i32) -> (i32, i32, i32) {
    %c0_i32 = arith.constant 0 : i32
    %c0_i32_0 = arith.constant 0 : i32
    return %arg0, %arg1, %c0_i32 : i32, i32, i32
  }
  func.func @transform_1(%arg0: i32, %arg1: i32, %arg2: i32) -> (i32, i32, i32) {
    %c0_i32 = arith.constant 0 : i32
    %c0_i32_0 = arith.constant 0 : i32
    return %arg0, %c0_i32, %arg2 : i32, i32, i32
  }
  func.func @transform_2(%arg0: i32, %arg1: i32, %arg2: i32) -> (i32, i32, i32, i32, i32) {
    %c0_i32 = arith.constant 0 : i32
    %c0_i32_0 = arith.constant 0 : i32
    %c0_i32_1 = arith.constant 0 : i32
    return %arg0, %arg1, %arg2, %c0_i32, %c0_i32_0 : i32, i32, i32, i32, i32
  }
}

</mosaic_0001>

<bundles_post_ra>
// kernel: tpu_custom_call.1
= control target key start
LH: loop header
LB: loop body
LE: loop exit
PB: predicated region body
PF: predicated region fallthrough
CT: control target
= control target key end

     0   :  { %s1114_s9 = smov 0   ;;  %s1116_s10 = smov 0   ;;  %s1178_s0 = inlined_call_operand.vmem [shape: f32[2,48,16], index: 0, kind: input, shape index: {}]   ;;  %s1179_s1 = inlined_call_operand.vmem [shape: f32[2,16,128], index: 1, kind: input, shape index: {}]   ;;  %s1180_s2 = inlined_call_operand.vmem [shape: f32[2,3,1,1,1], index: 2, kind: output, shape index: {}]  }
   0x1   :  { %s1118_s11 = smov 0   ;;  %s1120_s12 = smov 0  }
   0x2   :  { %s1122_s13 = smov 0  }
   0x3 LB: > { %s27_s14 = sadd.s32 1, %s1089_s11  ;;  %s31_s15 = sadd.s32 1, %s1093_s12  ;;  %s1097_s13 = sphi %s1122_s13, %s12_s13   ;;  %s1093_s12 = sphi %s1120_s12, %s1184_s12   ;;  %s1089_s11 = sphi %s1118_s11, %s1183_s11   ;;  %s1085_s10 = sphi %s1116_s10, %s1182_s10   ;;  %s1081_s9 = sphi %s1114_s9, %s1181_s9  }
   0x4   : > { %p29_p0 = scmp.ge.s32.totalorder %s27_s14, 3  ;;  %p891_p1 = scmp.ge.s32.totalorder %s1097_s13, 1 }
   0x5   : > { %p157_p2 = scmp.lt.s32.totalorder %s1097_s13, 7 }
   0x6   : > { %s1186_s14 = smov (%p29_p0, %s27_s14), 0  ;;  %s1188_s15 = smov (!%p29_p0, %s31_s15), %s1093_s12 }
   0x7   : > { %p158_p3 = pnand %p891_p1, %p157_p2  ;;  %p33_p4 = scmp.ge.s32.totalorder %s1188_s15, 2 }
   0x8   : > { %p197_p5 = scmp.lt.s32.totalorder (!%p158_p3), %s1085_s10, 1  ;;  %s892_s16 = sshll.u32 (!%p158_p3), %s1081_s9, 1  ;;  %vm228_vm0 = vcmask (!%p158_p3), 130048   ;;  %vm774_vm1 = vcmask (!%p158_p3), 0  }
   0x9   : > { %s1190_s15 = smov (%p33_p4, %s1188_s15), 0  ;;  %161 = sbr.rel (%p158_p3) target bundleno = 500 (0x1f4), region = 28 }
   0xa   : > { %p199_p6 = scmp.lt.s32.totalorder (!%p158_p3), %s892_s16, 5  ;;  %p216_p7 = scmp.lt.s32.totalorder (!%p158_p3), %s1081_s9, 2 }
  0x10   : > { %s1192_s10 = smov (!%p197_p5, %s1085_s10), 1  ;;  %s1194_s16 = smov (!%p199_p6, %s892_s16), 5 }
  0x11   : > { %s898_s17 = sshll.u32 %s1192_s10, 4  ;;  %s999_s18 = smul.u32 6, %s1192_s10 }
  0x12   : > { %s213_s21 = scalar_lea.vmem %s1179_s1, %s898_s17  ;;  %s1000_s27 = smul.u32 3, %s1192_s10 }
  0x13   : > { %v226_v0 = vld [vmem:[%s213_s21] sm:$0xff]  ;;  %v227_v1 = vld [vmem:[%s213_s21 + $0x8] sm:$0xff]  ;;  %s202_s22 = sadd.s32 %s999_s18, %s1194_s16  ;;  %s1196_s9 = smov (!%p216_p7, %s1081_s9), 2 }
  0x14   : > { %v236_v2 = vand.u32 4294901760, %v226_v0  ;;  %v239_v3 = vand.u32 4294901760, %v227_v1  ;;  %s893_s23 = sshll.u32 %s202_s22, 3  ;;  %s222_s28 = sadd.s32 %s1000_s27, %s1196_s9 }
  0x15   : > { %s204_s26 = scalar_lea.vmem %s1178_s0, %s893_s23  ;;  %s223_s3 = scalar_lea.vmem %s1180_s2, %s222_s28 }
  0x16   : > { %v965_v4 = vpack.c.bf16 %v239_v3, %v236_v2  ;;  %v224_v5 = vld [vmem:[%s204_s26] sm:$0xff]  ;;  %v225_v6 = vld [vmem:[%s204_s26 + $0x8] sm:$0xff]  ;;  %v324_v7 = vsub.f32 %v226_v0, %v236_v2  ;;  %v331_v8 = vsub.f32 %v227_v1, %v239_v3 }
  0x17   : > { %v230_v9 = vsel %vm228_vm0, %v224_v5, 0  ;;  %v233_v10 = vsel %vm228_vm0, %v225_v6, 0 }
  0x18   : > { %978 = vmatprep.subr.bf16.mxu0 %v965_v4  ;;  %966 = vmatprep.subr.bf16.mxu1 %v965_v4  ;;  %v302_v11 = vand.u32 4294901760, %v230_v9  ;;  %v312_v12 = vand.u32 4294901760, %v233_v10  ;;  %v325_v13 = vand.u32 4294901760, %v324_v7  ;;  %v332_v14 = vand.u32 4294901760, %v331_v8 }
  0x19   : > { %980 = vmatpush3.bf16.msra.mxu0 %v965_v4  ;;  %968 = vmatpush3.bf16.msra.mxu1 %v965_v4  ;;  %v973_v29 = vpack.c.bf16 %v331_v8, %v324_v7 }
  0x1a   : > { %v303_v15 = vsub.f32 %v230_v9, %v302_v11  ;;  %v313_v16 = vsub.f32 %v233_v10, %v312_v12  ;;  %v326_v17 = vsub.f32 %v324_v7, %v325_v13  ;;  %v333_v18 = vsub.f32 %v331_v8, %v332_v14 }
  0x1b   : > { %v981_v19 = vpack.c.bf16 %v332_v14, %v325_v13 }
  0x1c   : > { %v304_v20 = vand.u32 4294901760, %v303_v15  ;;  %v314_v21 = vand.u32 4294901760, %v313_v16  ;;  %v327_v22 = vand.u32 4294901760, %v326_v17  ;;  %v334_v23 = vand.u32 4294901760, %v333_v18 }
  0x1d   : > { %982 = vmatprep.subr.bf16.mxu0 %v981_v19 }
  0x1e   : > { %948 = vmatprep.mubr.f32.mxu0 %v304_v20  ;;  %v305_v24 = vsub.f32 %v303_v15, %v304_v20  ;;  %v969_v25 = vpack.c.bf16 %v334_v23, %v327_v22  ;;  %v315_v26 = vsub.f32 %v313_v16, %v314_v21 }
  0x1f   : > { %949 = vmatmul.mubr.f32.vlgmr.msra.gmra.mrb[0].mxu0 %v314_v21 }
  0x20   : > { %v306_v27 = vand.u32 4294901760, %v305_v24  ;;  %970 = vmatprep.subr.bf16.mxu1 %v969_v25  ;;  %v316_v28 = vand.u32 4294901760, %v315_v26  ;;  %984 = vmatpush3.bf16.msra.mxu0 %v981_v19 }
  0x21   : > { %955 = vmatprep.mubr.f32.mxu0 %v302_v11  ;;  %986 = vmatprep.subr.bf16.mxu0 %v965_v4 }
  0x22   : > { %927 = vmatprep.mubr.f32.mxu1 %v306_v27 }
  0x23   : > { %928 = vmatmul.mubr.f32.vlgmr.msra.gmra.mrb[0].mxu1 %v316_v28 }
  0x24   : > { %972 = vmatpush3.bf16.msra.mxu1 %v969_v25  ;;  %934 = vmatprep.mubr.f32.mxu1 %v302_v11 }
  0x25   : > { %974 = vmatprep.subr.bf16.mxu1 %v973_v29 }
  0x27   : > { %956 = vmatmul.mubr.f32.vlgmr.msra.gmra.mrb[0].mxu0 %v312_v12 }
  0x28   : > { %988 = vmatpush3.bf16.msra.mxu0 %v965_v4  ;;  %962 = vmatprep.mubr.f32.mxu0 %v302_v11 }
  0x2b   : > { %935 = vmatmul.mubr.f32.vlgmr.msra.gmra.mrb[0].mxu1 %v312_v12 }
  0x2c   : > { %976 = vmatpush3.bf16.msra.mxu1 %v973_v29  ;;  %941 = vmatprep.mubr.f32.mxu1 %v303_v15 }
  0x2f   : > { %963 = vmatmul.mubr.f32.vlgmr.msra.gmra.mrb[0].mxu0 %v312_v12 }
  0x33   : > { %942 = vmatmul.mubr.f32.vlgmr.msra.gmra.mrb[0].mxu1 %v313_v16 }
 0x102   : > { %v964_v30 = vpop.f32.mrb[0].mxu0 }
 0x103   : > { %v727_v31 = vpop.f32.mrb[1].mxu0 }
 0x106   : > { %v943_v32 = vpop.f32.mrb[0].mxu1 }
 0x107   : > { %v989_v33 = vadd.f32 %v964_v30, %v943_v32  ;;  %v481_v34 = vpop.f32.mrb[1].mxu1 }
 0x108   : > { %v990_v35 = vadd.f32 %v727_v31, %v481_v34 }
 0x109   : > { %v738_v36 = vand.u32 2147483647, %v989_v33 }
 0x10a   : > { %v737_v37 = vand.u32 2147483647, %v990_v35 }
 0x10b   : > { %v740_v38 = vsub.f32 0.0, %v738_v36 }
 0x10c   : > { %v739_v39 = vsub.f32 0.0, %v737_v37 }
 0x10d   : > { %v742_v40 = vadd.f32 0.25, %v740_v38  ;;  %v746_v41 = vadd.f32 0.5, %v740_v38  ;;  %v752_v42 = vadd.f32 1.0, %v740_v38  ;;  %v758_v45 = vadd.f32 2.0, %v740_v38 }
 0x10e   : > { %v741_v43 = vadd.f32 0.25, %v739_v39  ;;  %v745_v44 = vadd.f32 0.5, %v739_v39  ;;  %v751_v46 = vadd.f32 1.0, %v739_v39  ;;  %v757_v47 = vadd.f32 2.0, %v739_v39 }
 0x10f   : > { %1043 = vtanh.f32 %v742_v40 }
 0x110   : > { %1045 = vtanh.f32 %v746_v41 }
 0x111   : > { %1047 = vtanh.f32 %v752_v42 }
 0x112   : > { %1049 = vtanh.f32 %v741_v43 }
 0x113   : > { %1051 = vtanh.f32 %v745_v44 }
 0x114   : > { %1053 = vtanh.f32 %v758_v45 }
 0x115   : > { %1055 = vtanh.f32 %v751_v46 }
 0x116   : > { %1057 = vtanh.f32 %v757_v47 }
 0x119   : > { %v1044_v48 = vpop.eup %1043 }
 0x11a   : > { %v1046_v49 = vpop.eup %1045 }
 0x11b   : > { %v750_v50 = vadd.f32 %v1046_v49, %v1044_v48  ;;  %v1048_v51 = vpop.eup %1047 }
 0x11c   : > { %v1050_v52 = vpop.eup %1049 }
 0x11d   : > { %v756_v53 = vadd.f32 %v1048_v51, %v750_v50  ;;  %v1052_v54 = vpop.eup %1051 }
 0x11e   : > { %v1054_v55 = vpop.eup %1053  ;;  %v749_v56 = vadd.f32 %v1052_v54, %v1050_v52 }
 0x11f   : > { %v1056_v57 = vpop.eup %1055  ;;  %v762_v59 = vadd.f32 %v1054_v55, %v756_v53 }
 0x120   : > { %v755_v58 = vadd.f32 %v1056_v57, %v749_v56  ;;  %v1058_v60 = vpop.eup %1057 }
 0x122   : > { %v761_v61 = vadd.f32 %v1058_v60, %v755_v58 }
 0x124   : > { %v763_v62 = vadd.f32 %v762_v59, %v761_v61 }
 0x126   : > { %764 = vadd.xlane.f32.xlu0 %v763_v62 }
 0x1b3   : > { %v765_v63 = vpop.xlane.xlu0 %764 }
 0x1b4   : > { %v766_v0 = vrot.slane %v765_v63, 4 }
 0x1b6   : > { %v767_v1 = vadd.f32 %v766_v0, %v765_v63 }
 0x1b8   : > { %v768_v2 = vrot.slane %v767_v1, 2 }
 0x1ba   : > { %v769_v3 = vadd.f32 %v768_v2, %v767_v1 }
 0x1bc   : > { %v770_v4 = vrot.slane %v769_v3, 1 }
 0x1be   : > { %v771_v5 = vadd.f32 %v770_v4, %v769_v3 }
 0x1c0   : > { %1001 = vpush %v771_v5 }
 0x1f1   : > { %s1002_s4 = spop %1001 }
 0x1f2   : > { %v773_v6 = vstv %s1002_s4 }
 0x1f3   : > { %775 = vst.msk [vmem:[%s223_s3] sm:$0x1] %vm774_vm1, %v773_v6 }
 0x1f4 PF: > { %s12_s13 = sadd.s32 1, %s1097_s13   ;;  %s1181_s9 = smov %s1089_s11 }
 0x1f5   : > { %p9_p8 = scmp.ge.s32.totalorder %s12_s13, 8   ;;  %s1182_s10 = smov %s1093_s12 }
 0x1f6   : > { %s1183_s11 = smov %s1186_s14  ;;  %s1184_s12 = smov %s1190_s15 }
 0x1f7   :  { %11 = sbr.rel (!%p9_p8) target bundleno = 3 (0x3), region = 61 }

</bundles_post_ra>
